<compile_context>
chip_gen: v5e
topology: v5e:2x2
jax: 0.10.0
libtpu: 0.0.40
codegen_flags: <defaults>
</compile_context>

<pallas_src>
import jax
import jax.numpy as jnp
from jax.experimental import pallas as pl
from jax.experimental.pallas import tpu as pltpu


_LANE = 128                    # TPU lane width (fast last-dim vreg extent)
_TILE_BYTES_TARGET = 4 << 20   # ~4 MiB per tile; in+out double-buffered
                               # => ~16 MiB live, under the 32 MiB limit below.
_VMEM_LIMIT_BYTES = 32 << 20   # above v5e's 16 MiB scoped default, well under
                               # every chip's physical VMEM (incl. v7x 64 MiB).


def _sublane_pack(dtype) -> int:
    """Rows packed per sublane for this dtype (2nd-to-last block dim should be
    a multiple of this to avoid packed-layout repack traffic)."""
    itemsize = jnp.dtype(dtype).itemsize
    if itemsize >= 4:
        return 8
    if itemsize == 2:
        return 16
    return 32


def _dimension_semantics(num_blocks: int):
    """CORE_PARALLEL only on 2-TensorCore chips (v7x); 'parallel' elsewhere."""
    try:
        kind = jax.devices()[0].device_kind.lower()
    except Exception:  # pragma: no cover - defensive; default is always legal
        kind = ""
    if num_blocks >= 2 and ("v7" in kind or "7x" in kind):
        return (pltpu.CORE_PARALLEL,)
    return ("parallel",)


def _memory_efficient_op_kernel(x_ref, o_ref):
    # Base-class `_forward` hook: identity pass-through of the current tile.
    # Subclasses replace this body with real compute on x_ref[...] before
    # writing o_ref (see design notes in the module docstring).
    o_ref[...] = x_ref[...]


def _identity_copy_2d(x2):
    """Pallas identity copy of a (rows, 128) lane-dense array, row-tiled."""
    rows, lanes = x2.shape
    itemsize = jnp.dtype(x2.dtype).itemsize
    pack = _sublane_pack(x2.dtype)

    # Row tile sized to the VMEM budget, multiple of the sublane pack.
    tm_target = max(pack, (_TILE_BYTES_TARGET // (lanes * itemsize)) // pack * pack)
    if rows <= tm_target:
        tm = rows                      # single block == full array dims (legal)
    else:
        # Near-equal blocks: avoids one short masked-edge final tile and keeps
        # per-core work balanced once CORE_PARALLEL splits the grid on v7x.
        nblocks = pl.cdiv(rows, tm_target)
        tm = ((pl.cdiv(rows, nblocks) + pack - 1) // pack) * pack

    num_blocks = pl.cdiv(rows, tm)
    grid = (num_blocks,)

    return pl.pallas_call(
        _memory_efficient_op_kernel,
        out_shape=jax.ShapeDtypeStruct((rows, lanes), x2.dtype),
        grid_spec=pl.GridSpec(
            grid=grid,
            in_specs=[pl.BlockSpec((tm, lanes), lambda i: (i, 0))],
            out_specs=pl.BlockSpec((tm, lanes), lambda i: (i, 0)),
        ),
        compiler_params=pltpu.CompilerParams(
            dimension_semantics=_dimension_semantics(num_blocks),
            vmem_limit_bytes=_VMEM_LIMIT_BYTES,
        ),
        cost_estimate=pl.CostEstimate(
            flops=0,
            transcendentals=0,
            bytes_accessed=2 * rows * lanes * itemsize,
        ),
    )(x2)


def _pallas_passthrough(x):
    """Lane-dense Pallas identity of an arbitrary-shape array.

    Folds all elements into rows of 128 lanes (full-width stores), padding the
    flat element count up to a multiple of 128 if needed and slicing the pad
    off afterwards.  Only valid for identity / pure-elementwise bodies.
    """
    shape = x.shape
    total = 1
    for s in shape:
        total *= s
    if total == 0:
        return x

    pad_total = ((total + _LANE - 1) // _LANE) * _LANE
    x_flat = x.reshape(total)
    if pad_total != total:
        x_flat = jnp.pad(x_flat, (0, pad_total - total))

    rows = pad_total // _LANE
    y2 = _identity_copy_2d(x_flat.reshape(rows, _LANE))

    y_flat = y2.reshape(pad_total)
    if pad_total != total:
        y_flat = y_flat[:total]
    return y_flat.reshape(shape)


class MemoryEfficientOp:
    """JAX/Pallas port of the PyTorch base class (lazy init + dispatch)."""

    def __init__(self, input_dim: int, latent_dim: int,
                 materialize_with_pallas: bool = False):
        self.input_dim = input_dim
        self.latent_dim = latent_dim
        self._initialized = False
        # When False (default): zero-cost pass-through (`return x`), per the
        # perf review — no HBM traffic / pipeline launch for the identity.
        # When True: route through the Pallas scaffold subclasses build on.
        self.materialize_with_pallas = materialize_with_pallas

    def _lazy_init(self, x):
        # Base class: no parameters to initialize.
        pass

    def __call__(self, x):
        if not self._initialized:
            self._lazy_init(x)
            self._initialized = True
        return self._forward(x)

    def _forward(self, x):
        assert x.shape[-1] == self.input_dim, "last dim must equal input_dim"
        if not self.materialize_with_pallas:
            return x  # base-class identity: free on every generation
        return _pallas_passthrough(x)


if __name__ == "__main__":
    key = jax.random.PRNGKey(0)

    # Small demo shape consistent with the module signature.
    batch, seq, input_dim, latent_dim = 2, 8, 32, 16
    x = jax.random.normal(key, (batch, seq, input_dim), dtype=jnp.float32)

    # Base-class default path: zero-cost pass-through.
    op = MemoryEfficientOp(input_dim=input_dim, latent_dim=latent_dim)
    y = op(x)
    jax.block_until_ready(y)
    assert y.shape == x.shape and y.dtype == x.dtype
    assert bool(jnp.array_equal(y, x)), "base-class forward must be pass-through"

    # Pallas scaffold path (exercises the actual kernel).
    op_pallas = MemoryEfficientOp(input_dim=input_dim, latent_dim=latent_dim,
                                  materialize_with_pallas=True)
    y_pallas = op_pallas(x)
    jax.block_until_ready(y_pallas)
    assert bool(jnp.array_equal(y_pallas, x))

    # Multi-tile path in f32.
    k1, k2, k3 = jax.random.split(key, 3)
    x_big = jax.random.normal(k1, (2, 3000, 256), dtype=jnp.float32)
    op_big = MemoryEfficientOp(input_dim=256, latent_dim=64,
                               materialize_with_pallas=True)
    y_big = op_big(x_big)
    jax.block_until_ready(y_big)
    assert bool(jnp.array_equal(y_big, x_big))

    # bf16 path (sublane pack = 16).
    x_bf = jax.random.normal(k2, (2, 1024, 192), dtype=jnp.bfloat16)
    op_bf = MemoryEfficientOp(input_dim=192, latent_dim=48,
                              materialize_with_pallas=True)
    y_bf = op_bf(x_bf)
    jax.block_until_ready(y_bf)
    assert bool(jnp.array_equal(y_bf, x_bf))

    # Element count not divisible by 128: padded lane-dense path.
    x_odd = jax.random.normal(k3, (2, 7, 33), dtype=jnp.float32)
    op_odd = MemoryEfficientOp(input_dim=33, latent_dim=8,
                               materialize_with_pallas=True)
    y_odd = op_odd(x_odd)
    jax.block_until_ready(y_odd)
    assert bool(jnp.array_equal(y_odd, x_odd))

    print("KERNEL_OK")
</pallas_src>

<mosaic_0001>
module attributes {stable_mosaic.version = 11 : i64} {
  func.func @_memory_efficient_op_kernel(%arg0: i32, %arg1: memref<4x128xf32, #tpu.memory_space<vmem>>, %arg2: memref<4x128xf32, #tpu.memory_space<vmem>>) attributes {dimension_semantics = [#tpu.dimension_semantics<parallel>], iteration_bounds = array<i64: 1>, scalar_prefetch = 0 : i64, scratch_operands = 0 : i64, tpu.core_type = #tpu.core_type<tc>, window_params = [{transform_indices = @transform_0, window_bounds = array<i64: 4, 128>}, {transform_indices = @transform_1, window_bounds = array<i64: 4, 128>}]} {
    %c0 = arith.constant 0 : index
    %c0_0 = arith.constant 0 : index
    %0 = vector.load %arg1[%c0, %c0_0] : memref<4x128xf32, #tpu.memory_space<vmem>>, vector<4x128xf32>
    %c0_1 = arith.constant 0 : index
    %c0_2 = arith.constant 0 : index
    %1 = vector.load %arg2[%c0_1, %c0_2] : memref<4x128xf32, #tpu.memory_space<vmem>>, vector<4x128xf32>
    tpu.vector_store %arg2[%c0_1, %c0_2], %0 {strides = array<i32>} : memref<4x128xf32, #tpu.memory_space<vmem>>, vector<4x128xf32>,
    return
  }
  func.func @transform_0(%arg0: i32) -> (i32, i32) {
    %c0_i32 = arith.constant 0 : i32
    %c0_i32_0 = arith.constant 0 : i32
    return %arg0, %c0_i32 : i32, i32
  }
  func.func @transform_1(%arg0: i32) -> (i32, i32) {
    %c0_i32 = arith.constant 0 : i32
    %c0_i32_0 = arith.constant 0 : i32
    return %arg0, %c0_i32 : i32, i32
  }
}

</mosaic_0001>

<bundles_post_ra>
// kernel: tpu_custom_call.1
= control target key start
LH: loop header
LB: loop body
LE: loop exit
PB: predicated region body
PF: predicated region fallthrough
CT: control target
= control target key end

     0   :  { %6 = vsyncpa [#allocation3], 0  ;;  %s114_s0 = inlined_call_operand.hbm [shape: f32[4,128], index: 0, kind: input, shape index: {}]   ;;  %s115_s1 = inlined_call_operand.hbm [shape: f32[4,128], index: 1, kind: output, shape index: {}]  }
   0x1   :  { %7 = vsyncpa [#allocation4], 0  ;;  %s13_s8 = sshll.u32 %s114_s0, 4  ;;  %s96_s9 = smov [#allocation2]   ;;  %s14_s8 = int_to_ptr.hbm [resolvable:$true] %s13_s8 }
   0x2   :  { %s15_s10 = sshll.u32 %s96_s9, 4  ;;  %s16_s10 = int_to_ptr.vmem [resolvable:$true] %s15_s10 }
   0x3   :  { %18 = dma.hbm_to_vmem [thread:$0]  %s14_s8, 64, %s16_s10, [#allocation3]  }
   0x4   :  { %92 = dma.done.wait [#allocation3], 64  }
   0x5   :  { %93 = vsyncadd [#allocation3], 4294967232  ;;  %s97_s11 = smov [#allocation5]   ;;  %s32_s15 = sshll.u32 %s115_s1, 4  ;;  %v23_v0 = vld [vmem:[#allocation2] sm:$0xf]  ;;  %s33_s15 = int_to_ptr.hbm [resolvable:$true] %s32_s15 }
   0x6   :  { %s30_s12 = sshll.u32 %s97_s11, 4  ;;  %24 = vst [vmem:[#allocation5] sm:$0xf] %v23_v0  ;;  %s31_s12 = int_to_ptr.vmem [resolvable:$true] %s30_s12 }
   0x7   :  { %35 = dma.vmem_to_hbm [thread:$0]  %s31_s12, 64, %s33_s15, [#allocation4]  }
   0x8   :  { %94 = dma.done.wait [#allocation4], 64  }
   0x9   :  { %95 = vsyncadd [#allocation4], 4294967232 }
   0xa   :  { %40 = vsyncpa [#allocation3], 1 }
   0xb   :  { %41 = vsyncpa [#allocation4], 1 }

</bundles_post_ra>
